<compile_context>
chip_gen: v7x
topology: tpu7x:2x2x1
jax: 0.10.0
libtpu: 0.0.40
codegen_flags: <defaults>
</compile_context>

<pallas_src>
import math
import functools

import jax
import jax.numpy as jnp
from jax.experimental import pallas as pl
from jax.experimental.pallas import tpu as pltpu
from jax.scipy.special import erf as jax_erf


# --------------------------- generation-aware constants --------------------- #

def _tpu_vmem_capacity_bytes():
    try:
        return int(pltpu.get_tpu_info().vmem_capacity_bytes)
    except Exception:
        return 64 * 1024 * 1024   # conservative (v7x-sized) fallback


_VMEM_CAP = _tpu_vmem_capacity_bytes()
# 128 MiB parts (v5e/v6e): ~96 MB scoped VMEM, 512-row tiles.
# 64 MiB parts (v7x): ~48 MB scoped VMEM, 256-row tiles (operands are bf16).
_VMEM_LIMIT = max(32 << 20, min((_VMEM_CAP * 3) // 4, 96 << 20))
_ROW_TILE = 512 if _VMEM_CAP >= (100 << 20) else 256
_COL_TILE = 512


def _pick_tile(dim, preferred, align):
    """Largest multiple of `align` <= `preferred` that divides `dim`; falls
    back to the full dim only when no aligned divisor exists."""
    if dim <= preferred:
        return dim
    t = (preferred // align) * align
    while t >= align:
        if dim % t == 0:
            return t
        t -= align
    # TODO(synk): cdiv grid + masked epilogue for dims with no aligned divisor.
    return dim


# ------------------------------ kernels ------------------------------------ #

_INV_SQRT_2 = 1.0 / math.sqrt(2.0)


def _erf_approx(x):
    # Abramowitz & Stegun 7.1.26 (max abs err ~1.5e-7 vs exact erf); divide
    # replaced by the EUP approximate reciprocal (rides a free VLIW slot).
    p = 0.3275911
    a1, a2, a3, a4, a5 = (0.254829592, -0.284496736, 1.421413741,
                          -1.453152027, 1.061405429)
    sign = jnp.where(x >= 0.0, 1.0, -1.0)
    ax = jnp.abs(x)
    t = pl.reciprocal(1.0 + p * ax, approx=True)
    poly = ((((a5 * t + a4) * t + a3) * t + a2) * t + a1) * t
    return sign * (1.0 - poly * jnp.exp(-ax * ax))


def _qkv_attention_kernel(x_ref, w_ref, b_ref, o_ref, *, num_heads, head_dim,
                          hidden):
    """Fused QKV projection + multi-head self-attention, one batch per step.

    x: (1, S, D) f32;  w: (D, 3D) bf16 (resident);  b: (1, 3D) f32
    o: (1, S, D) bf16 lane-dense merge-heads layout.
    """
    xb = x_ref[0].astype(jnp.bfloat16)                                 # (S, D)
    qkv = jnp.dot(xb, w_ref[...], preferred_element_type=jnp.float32)  # (S, 3D)
    qkv = qkv + b_ref[...]
    scale = 1.0 / math.sqrt(head_dim)
    for h in range(num_heads):
        lo = h * head_dim
        qh = (qkv[:, lo:lo + head_dim] * scale).astype(jnp.bfloat16)           # (S, d)
        kh = qkv[:, hidden + lo:hidden + lo + head_dim].astype(jnp.bfloat16)   # (S, d)
        vh = qkv[:, 2 * hidden + lo:2 * hidden + lo + head_dim].astype(jnp.bfloat16)
        # q @ k^T without materializing a transpose.
        s = jax.lax.dot_general(qh, kh, (((1,), (1,)), ((), ())),
                                preferred_element_type=jnp.float32)    # (S, S)
        m = jnp.max(s, axis=-1, keepdims=True)
        p = jnp.exp(s - m)
        p = p * pl.reciprocal(jnp.sum(p, axis=-1, keepdims=True), approx=True)
        # TODO(synk): attention-prob dropout (training mode) not implemented.
        ctx = jnp.dot(p.astype(jnp.bfloat16), vh,
                      preferred_element_type=jnp.float32)              # (S, d)
        # Write the head slice directly; per-head temporaries die here.
        o_ref[0, :, lo:lo + head_dim] = ctx.astype(o_ref.dtype)


def _dense_gelu_kernel(x_ref, w_ref, b_ref, o_ref):
    # BertIntermediate: gelu(x @ W + b), exact-erf-style gelu.
    h = jnp.dot(x_ref[...].astype(jnp.bfloat16), w_ref[...],
                preferred_element_type=jnp.float32)
    h = h + b_ref[...]
    o_ref[...] = (h * 0.5 * (1.0 + _erf_approx(h * _INV_SQRT_2))).astype(o_ref.dtype)


def _dense_res_ln_kernel(x_ref, w_ref, b_ref, res_ref, g_ref, beta_ref, o_ref,
                         *, eps):
    # BertAttOutput / BertOutput: LayerNorm(x @ W + b + residual), LN in f32.
    h = jnp.dot(x_ref[...].astype(jnp.bfloat16), w_ref[...],
                preferred_element_type=jnp.float32)
    h = h + b_ref[...] + res_ref[...].astype(jnp.float32)
    mean = jnp.mean(h, axis=-1, keepdims=True)
    c = h - mean
    var = jnp.mean(c * c, axis=-1, keepdims=True)
    inv = jax.lax.rsqrt(var + eps)
    o_ref[...] = (c * inv * g_ref[...] + beta_ref[...]).astype(o_ref.dtype)


# --------------------------- pallas_call wrappers --------------------------- #

def _qkv_attention(x, wqkv, bqkv, num_heads, head_dim, hidden):
    """x: (B, S, D) -> (B, S, D) bf16 attention context (QKV fused in-kernel)."""
    B, S, D = x.shape
    three_h = wqkv.shape[1]
    kernel = functools.partial(_qkv_attention_kernel, num_heads=num_heads,
                               head_dim=head_dim, hidden=hidden)
    return pl.pallas_call(
        kernel,
        out_shape=jax.ShapeDtypeStruct((B, S, hidden), jnp.bfloat16),
        grid=(B,),
        in_specs=[
            pl.BlockSpec((1, S, D), lambda b: (b, 0, 0)),
            pl.BlockSpec((D, three_h), lambda b: (0, 0)),     # resident weight
            pl.BlockSpec((1, three_h), lambda b: (0, 0)),
        ],
        out_specs=pl.BlockSpec((1, S, hidden), lambda b: (b, 0, 0)),
        compiler_params=pltpu.CompilerParams(
            dimension_semantics=("parallel",),
            vmem_limit_bytes=_VMEM_LIMIT),
    )(x, wqkv, bqkv.reshape(1, three_h))


def _dense_gelu(x, w, b):
    """gelu(x @ w + b); grid is cols-outer / rows-inner so the weight tile is
    fetched once per column tile (not once per row tile)."""
    N, Din = x.shape
    Dout = w.shape[1]
    tm = _pick_tile(N, _ROW_TILE, 8)
    tn = _pick_tile(Dout, _COL_TILE, 128)
    grid = (Dout // tn, N // tm)          # (cols, rows): rows innermost
    return pl.pallas_call(
        _dense_gelu_kernel,
        out_shape=jax.ShapeDtypeStruct((N, Dout), jnp.bfloat16),
        grid=grid,
        in_specs=[
            pl.BlockSpec((tm, Din), lambda j, i: (i, 0)),
            pl.BlockSpec((Din, tn), lambda j, i: (0, j)),
            pl.BlockSpec((1, tn), lambda j, i: (0, j)),
        ],
        out_specs=pl.BlockSpec((tm, tn), lambda j, i: (i, j)),
        compiler_params=pltpu.CompilerParams(
            dimension_semantics=("parallel", "parallel"),
            vmem_limit_bytes=_VMEM_LIMIT),
    )(x, w, b.reshape(1, Dout))


def _dense_residual_layernorm(x, w, b, residual, gamma, beta, eps):
    """LayerNorm(x @ w + b + residual); full Dout per block (LN axis), f32 out."""
    N, Din = x.shape
    Dout = w.shape[1]
    tm = _pick_tile(N, _ROW_TILE, 8)
    grid = (N // tm,)
    kernel = functools.partial(_dense_res_ln_kernel, eps=eps)
    return pl.pallas_call(
        kernel,
        out_shape=jax.ShapeDtypeStruct((N, Dout), jnp.float32),
        grid=grid,
        in_specs=[
            pl.BlockSpec((tm, Din), lambda i: (i, 0)),
            pl.BlockSpec((Din, Dout), lambda i: (0, 0)),      # resident bf16 weight
            pl.BlockSpec((1, Dout), lambda i: (0, 0)),
            pl.BlockSpec((tm, Dout), lambda i: (i, 0)),
            pl.BlockSpec((1, Dout), lambda i: (0, 0)),
            pl.BlockSpec((1, Dout), lambda i: (0, 0)),
        ],
        out_specs=pl.BlockSpec((tm, Dout), lambda i: (i, 0)),
        compiler_params=pltpu.CompilerParams(
            dimension_semantics=("parallel",),
            vmem_limit_bytes=_VMEM_LIMIT),
    )(x, w, b.reshape(1, Dout), residual,
      gamma.reshape(1, Dout), beta.reshape(1, Dout))


# --------------------------- module wrapper --------------------------------- #

def _init_linear(key, fan_in, fan_out):
    # nn.Linear default init: U(-1/sqrt(fan_in), 1/sqrt(fan_in)).
    kw, kb = jax.random.split(key)
    bound = 1.0 / math.sqrt(fan_in)
    w = jax.random.uniform(kw, (fan_in, fan_out), jnp.float32, -bound, bound)
    b = jax.random.uniform(kb, (fan_out,), jnp.float32, -bound, bound)
    return w.astype(jnp.bfloat16), b        # bf16 weights, f32 bias


class BertLayerPallas:
    """BertLayer forward pass (eval mode) built from Pallas TPU kernels."""

    def __init__(self, hidden_size, num_heads, intermediate_size, key=None,
                 layer_norm_eps=1e-12):
        assert hidden_size % num_heads == 0
        self.hidden_size = hidden_size
        self.num_heads = num_heads
        self.head_dim = hidden_size // num_heads
        self.intermediate_size = intermediate_size
        self.eps = layer_norm_eps

        key = jax.random.PRNGKey(0) if key is None else key
        k_qkv, k_ao, k_in, k_out = jax.random.split(key, 4)

        D, I = hidden_size, intermediate_size
        # Fused Q|K|V projection (self-attention: ctx_dim == hidden_size).
        self.wqkv, self.bqkv = _init_linear(k_qkv, D, 3 * D)
        # BertAttOutput: dense + LayerNorm.
        self.wo, self.bo = _init_linear(k_ao, D, D)
        self.ln1_g = jnp.ones((D,), jnp.float32)
        self.ln1_b = jnp.zeros((D,), jnp.float32)
        # BertIntermediate: dense (+gelu).
        self.wi, self.bi = _init_linear(k_in, D, I)
        # BertOutput: dense + LayerNorm.
        self.wo2, self.bo2 = _init_linear(k_out, I, D)
        self.ln2_g = jnp.ones((D,), jnp.float32)
        self.ln2_b = jnp.zeros((D,), jnp.float32)

    def __call__(self, hidden_states):
        B, S, D = hidden_states.shape
        x2d = hidden_states.reshape(B * S, D)

        # Fused QKV projection + multi-head self-attention (bf16 context out).
        ctx = _qkv_attention(hidden_states, self.wqkv, self.bqkv,
                             self.num_heads, self.head_dim, D)
        ctx2d = ctx.reshape(B * S, D)

        # BertAttOutput: dense + (dropout=id) + LayerNorm(residual = input x).
        attn_out = _dense_residual_layernorm(
            ctx2d, self.wo, self.bo, x2d, self.ln1_g, self.ln1_b, self.eps)

        # BertIntermediate: dense + gelu (bf16 out).
        inter = _dense_gelu(attn_out, self.wi, self.bi)

        # BertOutput: dense + (dropout=id) + LayerNorm(residual = attn_out).
        out = _dense_residual_layernorm(
            inter, self.wo2, self.bo2, attn_out, self.ln2_g, self.ln2_b, self.eps)

        return out.reshape(B, S, D)


# ------------------------------- reference ---------------------------------- #

def _reference(mod, hidden_states):
    """Pure-JAX (XLA) f32 replica of the PyTorch BertLayer forward, eval mode.
    Uses the same bf16 weights (upcast to f32) so the comparison isolates the
    kernel's activation-side bf16 / approx-op error."""
    B, S, D = hidden_states.shape
    H, d = mod.num_heads, mod.head_dim
    x = hidden_states.reshape(B * S, D)

    wqkv = mod.wqkv.astype(jnp.float32)
    wo = mod.wo.astype(jnp.float32)
    wi = mod.wi.astype(jnp.float32)
    wo2 = mod.wo2.astype(jnp.float32)

    qkv = x @ wqkv + mod.bqkv
    q, k, v = qkv[:, :D], qkv[:, D:2 * D], qkv[:, 2 * D:]
    qh = q.reshape(B, S, H, d).transpose(0, 2, 1, 3)
    kh = k.reshape(B, S, H, d).transpose(0, 2, 1, 3)
    vh = v.reshape(B, S, H, d).transpose(0, 2, 1, 3)
    s = jnp.einsum("bhqd,bhkd->bhqk", qh, kh) / math.sqrt(d)
    p = jax.nn.softmax(s, axis=-1)
    ctx = jnp.einsum("bhqk,bhkd->bhqd", p, vh)
    ctx = ctx.transpose(0, 2, 1, 3).reshape(B * S, D)

    def ln(y, g, b):
        mu = y.mean(-1, keepdims=True)
        var = ((y - mu) ** 2).mean(-1, keepdims=True)
        return (y - mu) / jnp.sqrt(var + mod.eps) * g + b

    attn_out = ln(ctx @ wo + mod.bo + x, mod.ln1_g, mod.ln1_b)
    h = attn_out @ wi + mod.bi
    h = h * 0.5 * (1.0 + jax_erf(h / math.sqrt(2.0)))          # exact-erf gelu
    out = ln(h @ wo2 + mod.bo2 + attn_out, mod.ln2_g, mod.ln2_b)
    return out.reshape(B, S, D)


# --------------------------------- main -------------------------------------- #

if __name__ == "__main__":
    # small config: batch=2, seq=8, hidden=32, heads=4 (head_dim=8), intermediate=64
    B, S, D, H, I = 2, 8, 32, 4, 64

    key = jax.random.PRNGKey(0)
    k_x, k_params = jax.random.split(key)
    hidden_states = jax.random.normal(k_x, (B, S, D), jnp.float32)

    mod = BertLayerPallas(hidden_size=D, num_heads=H, intermediate_size=I,
                          key=k_params)

    out = jax.block_until_ready(mod(hidden_states))
    ref = _reference(mod, hidden_states)

    assert out.shape == (B, S, D), out.shape
    # Tolerance covers bf16 activation casts around the MXU (weights are shared
    # bf16 in kernel and reference), bf16-stored intermediates, the EUP approx
    # reciprocal (softmax denom / erf divide) and the polynomial erf; outputs
    # are O(1) post-LayerNorm.
    max_err = float(jnp.max(jnp.abs(out - ref)))
    assert jnp.allclose(out, ref, atol=3e-2, rtol=3e-2), max_err

    print("KERNEL_OK")
</pallas_src>

<mosaic_0001>
module attributes {stable_mosaic.version = 11 : i64} {
  func.func @_qkv_attention_kernel(%arg0: i32, %arg1: memref<1x8x32xf32, #tpu.memory_space<vmem>>, %arg2: memref<32x96xbf16, #tpu.memory_space<vmem>>, %arg3: memref<1x96xf32, #tpu.memory_space<vmem>>, %arg4: memref<1x8x32xbf16, #tpu.memory_space<vmem>>) attributes {dimension_semantics = [#tpu.dimension_semantics<parallel>], iteration_bounds = array<i64: 2>, scalar_prefetch = 0 : i64, scratch_operands = 0 : i64, tpu.core_type = #tpu.core_type<tc>, window_params = [{transform_indices = @transform_0, window_bounds = array<i64: 1, 8, 32>}, {pipeline_mode = #tpu.pipeline_mode<synchronous>, transform_indices = @transform_1, window_bounds = array<i64: 32, 96>}, {pipeline_mode = #tpu.pipeline_mode<synchronous>, transform_indices = @transform_2, window_bounds = array<i64: 1, 96>}, {transform_indices = @transform_3, window_bounds = array<i64: 1, 8, 32>}]} {
    %c0 = arith.constant 0 : index
    %c0_0 = arith.constant 0 : index
    %c0_1 = arith.constant 0 : index
    %0 = vector.load %arg1[%c0, %c0_0, %c0_1] : memref<1x8x32xf32, #tpu.memory_space<vmem>>, vector<1x8x32xf32>
    %1 = vector.shape_cast %0 : vector<1x8x32xf32> to vector<8x32xf32>
    %2 = arith.truncf %1 : vector<8x32xf32> to vector<8x32xbf16>
    %c0_2 = arith.constant 0 : index
    %c0_3 = arith.constant 0 : index
    %3 = vector.load %arg2[%c0_2, %c0_3] : memref<32x96xbf16, #tpu.memory_space<vmem>>, vector<32x96xbf16>
    %cst = arith.constant dense<0.000000e+00> : vector<8x96xf32>
    %4 = tpu.matmul %2, %3, %cst {dimension_numbers = #tpu.dot_dimension_numbers<[1], [0], [0], [1], [0, 0, 1, 1], [], []>} : vector<8x32xbf16>, vector<32x96xbf16>, vector<8x96xf32> -> vector<8x96xf32>
    %c0_4 = arith.constant 0 : index
    %c0_5 = arith.constant 0 : index
    %5 = vector.load %arg3[%c0_4, %c0_5] : memref<1x96xf32, #tpu.memory_space<vmem>>, vector<1x96xf32>
    %6 = vector.broadcast %5 : vector<1x96xf32> to vector<8x96xf32>
    %7 = arith.addf %4, %6 : vector<8x96xf32>
    %8 = vector.extract_strided_slice %7 {offsets = [0, 0], sizes = [8, 8], strides = [1, 1]} : vector<8x96xf32> to vector<8x8xf32>
    %cst_6 = arith.constant 0.353553385 : f32
    %9 = vector.broadcast %cst_6 : f32 to vector<8x8xf32>
    %10 = arith.mulf %8, %9 : vector<8x8xf32>
    %11 = arith.truncf %10 : vector<8x8xf32> to vector<8x8xbf16>
    %12 = vector.extract_strided_slice %7 {offsets = [0, 32], sizes = [8, 8], strides = [1, 1]} : vector<8x96xf32> to vector<8x8xf32>
    %13 = arith.truncf %12 : vector<8x8xf32> to vector<8x8xbf16>
    %14 = vector.extract_strided_slice %7 {offsets = [0, 64], sizes = [8, 8], strides = [1, 1]} : vector<8x96xf32> to vector<8x8xf32>
    %15 = arith.truncf %14 : vector<8x8xf32> to vector<8x8xbf16>
    %cst_7 = arith.constant dense<0.000000e+00> : vector<8x8xf32>
    %16 = tpu.matmul %11, %13, %cst_7 {dimension_numbers = #tpu.dot_dimension_numbers<[1], [1], [0], [0], [0, 0, 1, 0], [], []>} : vector<8x8xbf16>, vector<8x8xbf16>, vector<8x8xf32> -> vector<8x8xf32>
    %cst_8 = arith.constant dense<0xFF800000> : vector<8xf32>
    %17 = vector.multi_reduction <maximumf>, %16, %cst_8 [1] : vector<8x8xf32> to vector<8xf32>
    %18 = vector.shape_cast %17 : vector<8xf32> to vector<8x1xf32>
    %19 = vector.broadcast %18 : vector<8x1xf32> to vector<8x8xf32>
    %20 = arith.subf %16, %19 : vector<8x8xf32>
    %21 = math.exp %20 : vector<8x8xf32>
    %cst_9 = arith.constant dense<0.000000e+00> : vector<8xf32>
    %22 = vector.multi_reduction <add>, %21, %cst_9 [1] : vector<8x8xf32> to vector<8xf32>
    %23 = vector.shape_cast %22 : vector<8xf32> to vector<8x1xf32>
    %24 = tpu.reciprocal %23 {approx = true} : vector<8x1xf32> -> vector<8x1xf32>
    %25 = vector.broadcast %24 : vector<8x1xf32> to vector<8x8xf32>
    %26 = arith.mulf %21, %25 : vector<8x8xf32>
    %27 = arith.truncf %26 : vector<8x8xf32> to vector<8x8xbf16>
    %cst_10 = arith.constant dense<0.000000e+00> : vector<8x8xf32>
    %28 = tpu.matmul %27, %15, %cst_10 {dimension_numbers = #tpu.dot_dimension_numbers<[1], [0], [0], [1], [0, 0, 1, 1], [], []>} : vector<8x8xbf16>, vector<8x8xbf16>, vector<8x8xf32> -> vector<8x8xf32>
    %29 = arith.truncf %28 : vector<8x8xf32> to vector<8x8xbf16>
    %c0_11 = arith.constant 0 : index
    %c0_12 = arith.constant 0 : index
    %c0_13 = arith.constant 0 : index
    %30 = vector.load %arg4[%c0_11, %c0_12, %c0_13] : memref<1x8x32xbf16, #tpu.memory_space<vmem>>, vector<1x8x8xbf16>
    %31 = vector.shape_cast %30 : vector<1x8x8xbf16> to vector<8x8xbf16>
    %32 = vector.shape_cast %29 : vector<8x8xbf16> to vector<1x8x8xbf16>
    tpu.vector_store %arg4[%c0_11, %c0_12, %c0_13], %32 {strides = array<i32>} : memref<1x8x32xbf16, #tpu.memory_space<vmem>>, vector<1x8x8xbf16>,
    %33 = vector.extract_strided_slice %7 {offsets = [0, 8], sizes = [8, 8], strides = [1, 1]} : vector<8x96xf32> to vector<8x8xf32>
    %cst_14 = arith.constant 0.353553385 : f32
    %34 = vector.broadcast %cst_14 : f32 to vector<8x8xf32>
    %35 = arith.mulf %33, %34 : vector<8x8xf32>
    %36 = arith.truncf %35 : vector<8x8xf32> to vector<8x8xbf16>
    %37 = vector.extract_strided_slice %7 {offsets = [0, 40], sizes = [8, 8], strides = [1, 1]} : vector<8x96xf32> to vector<8x8xf32>
    %38 = arith.truncf %37 : vector<8x8xf32> to vector<8x8xbf16>
    %39 = vector.extract_strided_slice %7 {offsets = [0, 72], sizes = [8, 8], strides = [1, 1]} : vector<8x96xf32> to vector<8x8xf32>
    %40 = arith.truncf %39 : vector<8x8xf32> to vector<8x8xbf16>
    %cst_15 = arith.constant dense<0.000000e+00> : vector<8x8xf32>
    %41 = tpu.matmul %36, %38, %cst_15 {dimension_numbers = #tpu.dot_dimension_numbers<[1], [1], [0], [0], [0, 0, 1, 0], [], []>} : vector<8x8xbf16>, vector<8x8xbf16>, vector<8x8xf32> -> vector<8x8xf32>
    %cst_16 = arith.constant dense<0xFF800000> : vector<8xf32>
    %42 = vector.multi_reduction <maximumf>, %41, %cst_16 [1] : vector<8x8xf32> to vector<8xf32>
    %43 = vector.shape_cast %42 : vector<8xf32> to vector<8x1xf32>
    %44 = vector.broadcast %43 : vector<8x1xf32> to vector<8x8xf32>
    %45 = arith.subf %41, %44 : vector<8x8xf32>
    %46 = math.exp %45 : vector<8x8xf32>
    %cst_17 = arith.constant dense<0.000000e+00> : vector<8xf32>
    %47 = vector.multi_reduction <add>, %46, %cst_17 [1] : vector<8x8xf32> to vector<8xf32>
    %48 = vector.shape_cast %47 : vector<8xf32> to vector<8x1xf32>
    %49 = tpu.reciprocal %48 {approx = true} : vector<8x1xf32> -> vector<8x1xf32>
    %50 = vector.broadcast %49 : vector<8x1xf32> to vector<8x8xf32>
    %51 = arith.mulf %46, %50 : vector<8x8xf32>
    %52 = arith.truncf %51 : vector<8x8xf32> to vector<8x8xbf16>
    %cst_18 = arith.constant dense<0.000000e+00> : vector<8x8xf32>
    %53 = tpu.matmul %52, %40, %cst_18 {dimension_numbers = #tpu.dot_dimension_numbers<[1], [0], [0], [1], [0, 0, 1, 1], [], []>} : vector<8x8xbf16>, vector<8x8xbf16>, vector<8x8xf32> -> vector<8x8xf32>
    %54 = arith.truncf %53 : vector<8x8xf32> to vector<8x8xbf16>
    %c0_19 = arith.constant 0 : index
    %c0_20 = arith.constant 0 : index
    %c8 = arith.constant 8 : index
    %55 = vector.load %arg4[%c0_19, %c0_20, %c8] : memref<1x8x32xbf16, #tpu.memory_space<vmem>>, vector<1x8x8xbf16>
    %56 = vector.shape_cast %55 : vector<1x8x8xbf16> to vector<8x8xbf16>
    %57 = vector.shape_cast %54 : vector<8x8xbf16> to vector<1x8x8xbf16>
    tpu.vector_store %arg4[%c0_19, %c0_20, %c8], %57 {strides = array<i32>} : memref<1x8x32xbf16, #tpu.memory_space<vmem>>, vector<1x8x8xbf16>,
    %58 = vector.extract_strided_slice %7 {offsets = [0, 16], sizes = [8, 8], strides = [1, 1]} : vector<8x96xf32> to vector<8x8xf32>
    %cst_21 = arith.constant 0.353553385 : f32
    %59 = vector.broadcast %cst_21 : f32 to vector<8x8xf32>
    %60 = arith.mulf %58, %59 : vector<8x8xf32>
    %61 = arith.truncf %60 : vector<8x8xf32> to vector<8x8xbf16>
    %62 = vector.extract_strided_slice %7 {offsets = [0, 48], sizes = [8, 8], strides = [1, 1]} : vector<8x96xf32> to vector<8x8xf32>
    %63 = arith.truncf %62 : vector<8x8xf32> to vector<8x8xbf16>
    %64 = vector.extract_strided_slice %7 {offsets = [0, 80], sizes = [8, 8], strides = [1, 1]} : vector<8x96xf32> to vector<8x8xf32>
    %65 = arith.truncf %64 : vector<8x8xf32> to vector<8x8xbf16>
    %cst_22 = arith.constant dense<0.000000e+00> : vector<8x8xf32>
    %66 = tpu.matmul %61, %63, %cst_22 {dimension_numbers = #tpu.dot_dimension_numbers<[1], [1], [0], [0], [0, 0, 1, 0], [], []>} : vector<8x8xbf16>, vector<8x8xbf16>, vector<8x8xf32> -> vector<8x8xf32>
    %cst_23 = arith.constant dense<0xFF800000> : vector<8xf32>
    %67 = vector.multi_reduction <maximumf>, %66, %cst_23 [1] : vector<8x8xf32> to vector<8xf32>
    %68 = vector.shape_cast %67 : vector<8xf32> to vector<8x1xf32>
    %69 = vector.broadcast %68 : vector<8x1xf32> to vector<8x8xf32>
    %70 = arith.subf %66, %69 : vector<8x8xf32>
    %71 = math.exp %70 : vector<8x8xf32>
    %cst_24 = arith.constant dense<0.000000e+00> : vector<8xf32>
    %72 = vector.multi_reduction <add>, %71, %cst_24 [1] : vector<8x8xf32> to vector<8xf32>
    %73 = vector.shape_cast %72 : vector<8xf32> to vector<8x1xf32>
    %74 = tpu.reciprocal %73 {approx = true} : vector<8x1xf32> -> vector<8x1xf32>
    %75 = vector.broadcast %74 : vector<8x1xf32> to vector<8x8xf32>
    %76 = arith.mulf %71, %75 : vector<8x8xf32>
    %77 = arith.truncf %76 : vector<8x8xf32> to vector<8x8xbf16>
    %cst_25 = arith.constant dense<0.000000e+00> : vector<8x8xf32>
    %78 = tpu.matmul %77, %65, %cst_25 {dimension_numbers = #tpu.dot_dimension_numbers<[1], [0], [0], [1], [0, 0, 1, 1], [], []>} : vector<8x8xbf16>, vector<8x8xbf16>, vector<8x8xf32> -> vector<8x8xf32>
    %79 = arith.truncf %78 : vector<8x8xf32> to vector<8x8xbf16>
    %c0_26 = arith.constant 0 : index
    %c0_27 = arith.constant 0 : index
    %c16 = arith.constant 16 : index
    %80 = vector.load %arg4[%c0_26, %c0_27, %c16] : memref<1x8x32xbf16, #tpu.memory_space<vmem>>, vector<1x8x8xbf16>
    %81 = vector.shape_cast %80 : vector<1x8x8xbf16> to vector<8x8xbf16>
    %82 = vector.shape_cast %79 : vector<8x8xbf16> to vector<1x8x8xbf16>
    tpu.vector_store %arg4[%c0_26, %c0_27, %c16], %82 {strides = array<i32>} : memref<1x8x32xbf16, #tpu.memory_space<vmem>>, vector<1x8x8xbf16>,
    %83 = vector.extract_strided_slice %7 {offsets = [0, 24], sizes = [8, 8], strides = [1, 1]} : vector<8x96xf32> to vector<8x8xf32>
    %cst_28 = arith.constant 0.353553385 : f32
    %84 = vector.broadcast %cst_28 : f32 to vector<8x8xf32>
    %85 = arith.mulf %83, %84 : vector<8x8xf32>
    %86 = arith.truncf %85 : vector<8x8xf32> to vector<8x8xbf16>
    %87 = vector.extract_strided_slice %7 {offsets = [0, 56], sizes = [8, 8], strides = [1, 1]} : vector<8x96xf32> to vector<8x8xf32>
    %88 = arith.truncf %87 : vector<8x8xf32> to vector<8x8xbf16>
    %89 = vector.extract_strided_slice %7 {offsets = [0, 88], sizes = [8, 8], strides = [1, 1]} : vector<8x96xf32> to vector<8x8xf32>
    %90 = arith.truncf %89 : vector<8x8xf32> to vector<8x8xbf16>
    %cst_29 = arith.constant dense<0.000000e+00> : vector<8x8xf32>
    %91 = tpu.matmul %86, %88, %cst_29 {dimension_numbers = #tpu.dot_dimension_numbers<[1], [1], [0], [0], [0, 0, 1, 0], [], []>} : vector<8x8xbf16>, vector<8x8xbf16>, vector<8x8xf32> -> vector<8x8xf32>
    %cst_30 = arith.constant dense<0xFF800000> : vector<8xf32>
    %92 = vector.multi_reduction <maximumf>, %91, %cst_30 [1] : vector<8x8xf32> to vector<8xf32>
    %93 = vector.shape_cast %92 : vector<8xf32> to vector<8x1xf32>
    %94 = vector.broadcast %93 : vector<8x1xf32> to vector<8x8xf32>
    %95 = arith.subf %91, %94 : vector<8x8xf32>
    %96 = math.exp %95 : vector<8x8xf32>
    %cst_31 = arith.constant dense<0.000000e+00> : vector<8xf32>
    %97 = vector.multi_reduction <add>, %96, %cst_31 [1] : vector<8x8xf32> to vector<8xf32>
    %98 = vector.shape_cast %97 : vector<8xf32> to vector<8x1xf32>
    %99 = tpu.reciprocal %98 {approx = true} : vector<8x1xf32> -> vector<8x1xf32>
    %100 = vector.broadcast %99 : vector<8x1xf32> to vector<8x8xf32>
    %101 = arith.mulf %96, %100 : vector<8x8xf32>
    %102 = arith.truncf %101 : vector<8x8xf32> to vector<8x8xbf16>
    %cst_32 = arith.constant dense<0.000000e+00> : vector<8x8xf32>
    %103 = tpu.matmul %102, %90, %cst_32 {dimension_numbers = #tpu.dot_dimension_numbers<[1], [0], [0], [1], [0, 0, 1, 1], [], []>} : vector<8x8xbf16>, vector<8x8xbf16>, vector<8x8xf32> -> vector<8x8xf32>
    %104 = arith.truncf %103 : vector<8x8xf32> to vector<8x8xbf16>
    %c0_33 = arith.constant 0 : index
    %c0_34 = arith.constant 0 : index
    %c24 = arith.constant 24 : index
    %105 = vector.load %arg4[%c0_33, %c0_34, %c24] : memref<1x8x32xbf16, #tpu.memory_space<vmem>>, vector<1x8x8xbf16>
    %106 = vector.shape_cast %105 : vector<1x8x8xbf16> to vector<8x8xbf16>
    %107 = vector.shape_cast %104 : vector<8x8xbf16> to vector<1x8x8xbf16>
    tpu.vector_store %arg4[%c0_33, %c0_34, %c24], %107 {strides = array<i32>} : memref<1x8x32xbf16, #tpu.memory_space<vmem>>, vector<1x8x8xbf16>,
    return
  }
  func.func @transform_0(%arg0: i32) -> (i32, i32, i32) {
    %c0_i32 = arith.constant 0 : i32
    %c0_i32_0 = arith.constant 0 : i32
    %c0_i32_1 = arith.constant 0 : i32
    return %arg0, %c0_i32, %c0_i32_0 : i32, i32, i32
  }
  func.func @transform_1(%arg0: i32) -> (i32, i32) {
    %c0_i32 = arith.constant 0 : i32
    %c0_i32_0 = arith.constant 0 : i32
    %c0_i32_1 = arith.constant 0 : i32
    return %c0_i32, %c0_i32_0 : i32, i32
  }
  func.func @transform_2(%arg0: i32) -> (i32, i32) {
    %c0_i32 = arith.constant 0 : i32
    %c0_i32_0 = arith.constant 0 : i32
    %c0_i32_1 = arith.constant 0 : i32
    return %c0_i32, %c0_i32_0 : i32, i32
  }
  func.func @transform_3(%arg0: i32) -> (i32, i32, i32) {
    %c0_i32 = arith.constant 0 : i32
    %c0_i32_0 = arith.constant 0 : i32
    %c0_i32_1 = arith.constant 0 : i32
    return %arg0, %c0_i32, %c0_i32_0 : i32, i32, i32
  }
}

</mosaic_0001>

<bundles_post_ra>
// kernel: tpu_custom_call.1
= control target key start
LH: loop header
LB: loop body
LE: loop exit
PB: predicated region body
PF: predicated region fallthrough
CT: control target
= control target key end

     0   :  { %8 = vsyncpa [#allocation3], 0  ;;  %s1480_s0 = inlined_call_operand.hbm [shape: f32[2,8,32], index: 0, kind: input, shape index: {}]   ;;  %s1481_s1 = inlined_call_operand.hbm [shape: bf16[32,96], index: 1, kind: input, shape index: {}]   ;;  %s1482_s2 = inlined_call_operand.vmem [shape: f32[1,96], index: 2, kind: input, shape index: {}]   ;;  %s1483_s3 = inlined_call_operand.hbm [shape: bf16[2,8,32], index: 3, kind: output, shape index: {}]  }
   0x1   :  { %10 = vsyncpa [#allocation3 + $0x1], 0 }
   0x2   :  { %11 = vsyncpa [#allocation6], 0 }
   0x3   :  { %12 = vsyncpa [#allocation4], 0 }
   0x4   :  { %14 = vsyncpa [#allocation4 + $0x1], 0  ;;  %s1211_s12 = smov 0   ;;  %s1213_s13 = smov 0  }
   0x5   :  { %s1215_s14 = smov 0   ;;  %s1217_s15 = smov 0  }
   0x6 LB: > { %s1232_s16 = sadd.s32 4294967295, %s1168_s15   ;;  %s840_s17 = sadd.s32 4294967294, %s1168_s15   ;;  %s1168_s15 = sphi %s1217_s15, %s1503_s15   ;;  %s1164_s14 = sphi %s1215_s14, %s1502_s14   ;;  %s1160_s13 = sphi %s1213_s13, %s1501_s13   ;;  %s1156_s12 = sphi %s1211_s12, %s1500_s12  }
   0x7   : > { %p40_p0 = scmp.ne.s32.totalorder %s1160_s13, %s1156_s12  ;;  %p1484_p1 = scmp.eq.s32.totalorder %s1232_s16, 0 }
   0x8   : > { %p112_p3 = scmp.eq.s32.totalorder %s840_s17, 1  ;;  %p841_p5 = scmp.ge.s32.totalorder %s1168_s15, 1 }
   0x9   : > { %p1241_p4 = por %p1484_p1, %p40_p0  ;;  %p119_p7 = scmp.lt.s32.totalorder %s1168_s15, 3 }
   0xa   : > { %p1246_p6 = por %p112_p3, %p40_p0  ;;  %s1170_s21 = smov [#allocation5]  }
   0xb   : > { %s1487_s18 = scalar_select %p1241_p4, 1, 0 }
   0xc   : > { %s1488_s19 = scalar_select %p1246_p6, 1, 0 }
   0xd   : > { %p1251_p8 = pnand %p841_p5, %p119_p7  ;;  %s131_s22 = sshll.u32 %s1170_s21, 4  ;;  %s1255_s22 = int_to_ptr.vmem [resolvable:$true] %s131_s22 }
   0xe   : > { %s1267_s24 = sadd.s32 1, %s1168_s15   ;;  %s27_s25 = sadd.s32 1, %s1164_s14 }
   0xf   : > { %s1489_s20 = scalar_select %p1251_p8, 1, 0 }
  0x10   : > { %p955_p9 = pneg %p1251_p8  ;;  %s24_s26 = ssub.s32 %s1168_s15, %s1267_s24 }
  0x11   : > { %s1040_s29 = scalar_lea.hbm %s1481_s1, 256 }
  0x12   : > { %p1262_p11 = pnand %p955_p9, %p1484_p1  ;;  %p1041_p12 = scmp.ne.s32.totalorder %s1481_s1, %s1040_s29 }
  0x13   : > { %p1047_p5 = scmp.lt.u32.totalorder %s1040_s29, %s1481_s1 }
  0x14   : > { %p1042_p13 = pneg %p1262_p11 }
  0x16   : > { %p1043_p0 = pnand %p1042_p13, %p1041_p12 }
  0x18   : > { %p1044_p3 = pneg %p1043_p0 }
  0x1a   : > { %p1049_p7 = pnand %p1047_p5, %p1044_p3 }
  0x1c   : > { %1052 = shalt.err (!%p1049_p7)
}
  0x1d   : > { %s1053_s7 = scalar_lea.vmem %s1255_s22, 256  ;;  %p1061_p2 = scmp.lt.s32.totalorder %s1255_s22, %s1255_s22 }
  0x1e   : > { %p1054_p9 = scmp.ne.s32.totalorder %s1255_s22, %s1053_s7  ;;  %p1062_p6 = scmp.lt.s32.totalorder %s1053_s7, %s1053_s7 }
  0x20   : > { %p1056_p10 = pnand %p1054_p9, %p1042_p13  ;;  %p1063_p4 = por %p1062_p6, %p1061_p2 }
  0x22   : > { %p1057_p1 = pneg %p1056_p10 }
  0x24   : > { %p1064_p8 = pnand %p1063_p4, %p1057_p1 }
  0x26   : > { %1067 = shalt.err (!%p1064_p8)
}
  0x27   : > { %s1171_s8 = smov 64   ;;  %s1172_s9 = smov 4  }
  0x28   : > { %958 = dma.hbm_to_vmem [thread:$0]  (!%p1262_p11), %s1481_s1, 256, %s1255_s22, [#allocation6], %s1171_s8, %s1171_s8, %s1172_s9  }
  0x29   : > { %p25_p2 = scmp.eq.s32.totalorder %s24_s26, 0  ;;  %p34_p1 = scmp.ne.s32.totalorder %s1164_s14, %s1160_s13 }
  0x2a   : > { %p35_p4 = scmp.eq.s32.totalorder %s1168_s15, 0  ;;  %p968_p6 = scmp.lt.s32.totalorder %s1168_s15, 2 }
  0x2b   : > { %s1298_s17 = scalar_select %p25_p2, %s1164_s14, %s27_s25  }
  0x2c   : > { %p36_p8 = por %p35_p4, %p34_p1  ;;  %p1491_p10 = scmp.eq.s32.totalorder %s1232_s16, 1 }
  0x2d   : > { %s148_s27 = sand.u32 1, %s1164_s14   ;;  %s845_s28 = sshll.u32 %s1168_s15, 7 }
  0x2e   : > { %p1302_p12 = por %p1491_p10, %p34_p1  ;;  %s844_s29 = sshll.u32 %s148_s27, 3 }
  0x2f   : > { %s1311_s4 = scalar_lea.hbm %s1480_s0, %s845_s28  ;;  %s152_s22 = scalar_lea.vmem [#allocation2], %s844_s29 }
  0x30   : > { %s159_s25 = sshll.u32 %s152_s22, 4  ;;  %p1313_p11 = pnand %p968_p6, %p36_p8  ;;  %s1317_s25 = int_to_ptr.vmem [resolvable:$true] %s159_s25 }
  0x31   : > { %s149_s5 = scalar_lea.sflag [#allocation3], %s148_s27  ;;  %s1068_s6 = scalar_lea.hbm %s1311_s4, 128 }
  0x32   : > { %p1069_p13 = scmp.ne.s32.totalorder %s1311_s4, %s1068_s6  ;;  %p1070_p0 = pneg %p1313_p11 }
  0x33   : > { %s1073_s9 = scalar_lea.hbm %s1480_s0, 256  ;;  %p1074_p7 = scmp.lt.u32.totalorder %s1311_s4, %s1480_s0 }
  0x34   : > { %p1071_p3 = pnand %p1070_p0, %p1069_p13  ;;  %p1075_p9 = scmp.lt.u32.totalorder %s1073_s9, %s1068_s6 }
  0x35   : > { %p1077_p1 = scmp.lt.u32.totalorder %s1068_s6, %s1311_s4 }
  0x36   : > { %p1072_p5 = pneg %p1071_p3  ;;  %p1076_p2 = por %p1075_p9, %p1074_p7 }
  0x38   : > { %p1078_p4 = por %p1077_p1, %p1076_p2 }
  0x3a   : > { %p1079_p6 = pnand %p1078_p4, %p1072_p5 }
  0x3c   : > { %1082 = shalt.err (!%p1079_p6)
}
  0x3d   : > { %s1083_s27 = scalar_lea.vmem %s1317_s25, 128  ;;  %s1173_s28 = smov [#allocation2]  }
  0x3e   : > { %p1084_p8 = scmp.ne.s32.totalorder %s1317_s25, %s1083_s27  ;;  %s1088_s29 = sshll.u32 %s1173_s28, 4  ;;  %s1089_s29 = int_to_ptr.vmem [resolvable:$false] %s1088_s29 }
  0x3f   : > { %s1090_s23 = scalar_lea.vmem %s1089_s29, 256  ;;  %p1091_p3 = scmp.lt.s32.totalorder %s1317_s25, %s1089_s29 }
  0x40   : > { %p1086_p10 = pnand %p1084_p8, %p1070_p0  ;;  %p1092_p7 = scmp.lt.s32.totalorder %s1090_s23, %s1083_s27 }
  0x42   : > { %p1087_p13 = pneg %p1086_p10  ;;  %p1093_p9 = por %p1092_p7, %p1091_p3 }
  0x44   : > { %p1094_p2 = pnand %p1093_p9, %p1087_p13 }
  0x46   : > { %1097 = shalt.err (!%p1094_p2)
}
  0x47   : > { %962 = dma.hbm_to_vmem [thread:$0]  (!%p1313_p11), %s1311_s4, 128, %s1317_s25, %s149_s5  }
  0x48   : > { %p1494_p5 = scmp.ne.s32.totalorder %s1489_s20, 0 }
  0x49   : > { %s1347_s30 = sand.u32 (!%p1494_p5), 1, %s1160_s13   ;;  %p1495_p0 = scmp.ne.s32.totalorder (!%p1494_p5), %s1487_s18, 0 }
  0x4a   : > { %168 = sbr.rel (%p1494_p5) target bundleno = 1367 (0x557), region = 32  ;;  %s847_s22 = sshll.u32 (!%p1494_p5), %s1347_s30, 3 }
  0x4b   : > { %s171_s6 = scalar_lea.sflag (!%p1494_p5), [#allocation3], %s1347_s30  ;;  %s174_s7 = scalar_lea.vmem (!%p1494_p5), [#allocation2], %s847_s22 }
  0x51   : > { %1143 = dma.done.wait (%p1495_p0), %s171_s6, 128  }
  0x52   : > { %1145 = vsyncadd (%p1495_p0), %s171_s6, 4294967168  ;;  %p1496_p1 = scmp.eq.s32.totalorder %s1232_s16, 0 }
  0x54   : > { %1147 = dma.done.wait (%p1496_p1), [#allocation6], 256   ;;  %p1497_p11 = pmov %p1496_p1 }
  0x55   : > { %v1174_v0 = vmov 0.0   ;;  %vm1175_vm0 = vmmov 0   ;;  %v1022_v1 = vld [vmem:[#allocation5] sm:$0xff]   ;;  %v1023_v2 = vld [vmem:[#allocation5 + $0x8] sm:$0xff]   ;;  %v202_v3 = vld [vmem:[%s174_s7] sm:$0xff]  ;;  %vm227_vm1 = vcmask 261120  }
  0x56   : > { %1149 = vsyncadd (%p1497_p11), [#allocation6], 4294967040  ;;  %891 = vmatprep.subr.bf16.mxu0 %v1174_v0  ;;  %895 = vmatprep.mubr.msk.bf16.mxu0 %vm1175_vm0, %v1174_v0  ;;  %v203_v4 = vpack.c.bf16 %v202_v3, %v202_v3  ;;  %v850_v5 = vld [vmem:[%s1482_s2] ss:$0 sm:$0xff]  ;;  %s1176_s4 = smov 96   ;;  %s1177_s25 = smov 120  }
  0x57   : > { %899 = vmatprep.subr.bf16.mxu1 %v1174_v0  ;;  %901 = vmatprep.mubr.msk.bf16.mxu1 %vm1175_vm0, %v1174_v0  ;;  %s1178_s26 = smov 88   ;;  %s1179_s5 = smov 80   ;;  %vm277_vm2 = vcmask 64512   ;;  %vm341_vm3 = vcmask 1043456   ;;  %vm386_vm4 = vcmask 60416   ;;  %vm506_vm5 = vcmask 126016  }
  0x58   : > { %892 = vmatpush3.bf16.msra.mxu0 %v1022_v1  ;;  %s1180_s8 = smov 112   ;;  %s1181_s9 = smov 72   ;;  %vm625_vm6 = vcmask 191616   ;;  %vm744_vm7 = vcmask 257216  }
  0x59   : > { %893 = vmatprep.subr.bf16.mxu0 %v1174_v0  ;;  %s1182_s10 = smov 104   ;;  %s1183_s11 = smov 56  }
  0x5a   : > { %s1184_s27 = smov 64   ;;  %s1185_s28 = smov 40  }
  0x5b   : > { %s1186_s29 = smov 48   ;;  %s849_s23 = sshll.u32 %s1347_s30, 2 }
  0x5c   : > { %894 = vmatpush3.bf16.msra.mxu0 %v1023_v2  ;;  %s1425_s22 = scalar_lea.vmem [#allocation7], %s849_s23  ;;  %s1187_s6 = smov 8  }
  0x5d   : > { %905 = vmatprep.subr.bf16.mxu0 %v1174_v0  ;;  %s1188_s7 = smov 16   ;;  %s1189_s18 = smov 24  }
  0x5e   : > { %s866_s20 = sshll.u32 %s1232_s16, 6  ;;  %s1190_s16 = smov [#allocation7]  }
  0x5f   : > { %896 = vmatmul.mubr.msk.bf16.vlgmr.msra.gmra.mrb[0].mxu0 %vm227_vm1, %v203_v4 }
  0x60   : > { %907 = vmatprep.mubr.msk.bf16.mxu0 %vm1175_vm0, %v1174_v0 }
 0x132   : > { %v265_v6 = vpop.f32.mrb[0].mxu0 }
 0x133   : > { %v266_v7 = vadd.f32 %v850_v5, %v265_v6  ;;  %v897_v8 = vpop.f32.mrb[1].mxu0 }
 0x134   : > { %v268_v9 = vpop.f32.mrb[2].mxu0 }
 0x135   : > { %v271_v10 = vmul.f32 0.35355338, %v266_v7  ;;  %v1372_v11 = vpack.c.bf16 %v266_v7, %v266_v7  ;;  %v898_v12 = vpop.f32.mrb[3].mxu0 }
 0x137   : > { %v272_v13 = vpack.c.bf16 %v271_v10, %v271_v10  ;;  %275 = vrot.lane.b32.xlu0 %v1372_v11, %s1176_s4  ;;  %s760_s4 = sshll.u32 %s1425_s22, 4  ;;  %s1437_s4 = int_to_ptr.vmem [resolvable:$true] %s760_s4 }
 0x139   : > { %389 = vrot.lane.b32.xlu1 %v272_v13, %s1177_s25 }
 0x13b   : > { %391 = vrot.lane.b32.xlu0 %v1372_v11, %s1178_s26 }
 0x13d   : > { %510 = vrot.lane.b32.xlu1 %v1372_v11, %s1179_s5  ;;  %s1435_s5 = scalar_lea.hbm %s1483_s3, %s866_s20 }
 0x13f   : > { %508 = vrot.lane.b32.xlu0 %v272_v13, %s1180_s8  ;;  %s747_s8 = scalar_lea.sflag [#allocation4], %s1347_s30 }
 0x141   : > { %629 = vrot.lane.b32.xlu1 %v1372_v11, %s1181_s9  ;;  %s1098_s9 = scalar_lea.vmem %s1437_s4, 64 }
 0x142   : > { %p1099_p4 = scmp.ne.s32.totalorder %s1437_s4, %s1098_s9 }
 0x143   : > { %627 = vrot.lane.b32.xlu0 %v272_v13, %s1182_s10  ;;  %s1102_s10 = sshll.u32 %s1190_s16, 4  ;;  %s1103_s10 = int_to_ptr.vmem [resolvable:$false] %s1102_s10 }
 0x144   : > { %p1100_p6 = pnand %p1099_p4, %p1302_p12  ;;  %p1105_p10 = scmp.lt.s32.totalorder %s1437_s4, %s1103_s10 }
 0x146   : > { %p1101_p8 = pneg %p1100_p6 }
 0x1a9   : > { %v276_v14 = vpop.permute.xlu0 %275 }
 0x1aa   : > { %v282_v15 = vsel %vm277_vm2, %v276_v14, 0 }
 0x1ab   : > { %900 = vmatpush3.bf16.xpose.msra.mxu1 %v282_v15  ;;  %v390_v17 = vpop.permute.xlu1 %389 }
 0x1ac   : > { %911 = vmatprep.subr.bf16.mxu1 %v1174_v0 }
 0x1ad   : > { %v392_v16 = vpop.permute.xlu0 %391 }
 0x1ae   : > { %v397_v18 = vsel %vm277_vm2, %v392_v16, 0 }
 0x1af   : > { %v511_v19 = vpop.permute.xlu1 %510 }
 0x1b0   : > { %v516_v20 = vsel %vm277_vm2, %v511_v19, 0 }
 0x1b1   : > { %v509_v22 = vpop.permute.xlu0 %508 }
 0x1b2   : > { %902 = vmatmul.mubr.msk.bf16.vlgmr.msra.gmra.mrb[0].mxu1 %vm277_vm2, %v272_v13 }
 0x1b3   : > { %912 = vmatpush3.bf16.xpose.msra.mxu1 %v397_v18  ;;  %913 = vmatprep.mubr.msk.bf16.mxu1 %vm1175_vm0, %v1174_v0  ;;  %v630_v21 = vpop.permute.xlu1 %629 }
 0x1b4   : > { %923 = vmatprep.subr.bf16.mxu1 %v1174_v0  ;;  %v635_v23 = vsel %vm277_vm2, %v630_v21, 0 }
 0x1b5   : > { %v628_v24 = vpop.permute.xlu0 %627 }
 0x1ba   : > { %914 = vmatmul.mubr.msk.bf16.vlgmr.msra.gmra.mrb[4].mxu1 %vm277_vm2, %v390_v17 }
 0x1bb   : > { %924 = vmatpush3.bf16.xpose.msra.mxu1 %v516_v20  ;;  %925 = vmatprep.mubr.msk.bf16.mxu1 %vm1175_vm0, %v1174_v0 }
 0x1bc   : > { %935 = vmatprep.subr.bf16.mxu1 %v1174_v0 }
 0x1c2   : > { %926 = vmatmul.mubr.msk.bf16.vlgmr.msra.gmra.mrb[8].mxu1 %vm277_vm2, %v509_v22 }
 0x1c3   : > { %936 = vmatpush3.bf16.xpose.msra.mxu1 %v635_v23  ;;  %937 = vmatprep.mubr.msk.bf16.mxu1 %vm1175_vm0, %v1174_v0 }
 0x1ca   : > { %938 = vmatmul.mubr.msk.bf16.vlgmr.msra.gmra.mrb[12].mxu1 %vm277_vm2, %v628_v24 }
 0x285   : > { %v318_v25 = vpop.f32.mrb[0].mxu1 }
 0x286   : > { %v903_v26 = vpop.f32.mrb[1].mxu1  ;;  %v324_v27 = vsel %vm277_vm2, %v318_v25, -inf }
 0x287   : > { %325 = vmax.xlane.f32.xlu1 %v324_v27  ;;  %v321_v28 = vpop.f32.mrb[2].mxu1 }
 0x288   : > { %v904_v29 = vpop.f32.mrb[3].mxu1 }
 0x28d   : > { %v433_v30 = vpop.f32.mrb[4].mxu1 }
 0x28e   : > { %v915_v31 = vpop.f32.mrb[5].mxu1  ;;  %v439_v32 = vsel %vm277_vm2, %v433_v30, -inf }
 0x28f   : > { %440 = vmax.xlane.f32.xlu0 %v439_v32  ;;  %v436_v33 = vpop.f32.mrb[6].mxu1 }
 0x290   : > { %v916_v34 = vpop.f32.mrb[7].mxu1 }
 0x295   : > { %v552_v35 = vpop.f32.mrb[8].mxu1 }
 0x296   : > { %v927_v36 = vpop.f32.mrb[9].mxu1  ;;  %v558_v37 = vsel %vm277_vm2, %v552_v35, -inf }
 0x297   : > { %559 = vmax.xlane.f32.xlu0 %v558_v37  ;;  %v555_v38 = vpop.f32.mrb[10].mxu1 }
 0x298   : > { %v928_v39 = vpop.f32.mrb[11].mxu1 }
 0x29d   : > { %v671_v40 = vpop.f32.mrb[12].mxu1 }
 0x29e   : > { %v939_v41 = vpop.f32.mrb[13].mxu1  ;;  %v677_v42 = vsel %vm277_vm2, %v671_v40, -inf }
 0x29f   : > { %678 = vmax.xlane.f32.xlu1 %v677_v42  ;;  %v674_v43 = vpop.f32.mrb[14].mxu1 }
 0x2a0   : > { %v940_v44 = vpop.f32.mrb[15].mxu1 }
 0x314   : > { %v326_v45 = vpop.xlane.xlu1 %325 }
 0x315   : > { %v327_v46 = vsub.f32 %v318_v25, %v326_v45 }
 0x317   : > { %v328_v47 = vmul.f32 1.442695, %v327_v46 }
 0x319   : > { %1024 = vpow2.f32 %v328_v47 }
 0x31c   : > { %v441_v48 = vpop.xlane.xlu0 %440 }
 0x31d   : > { %v442_v49 = vsub.f32 %v433_v30, %v441_v48 }
 0x31f   : > { %v443_v50 = vmul.f32 1.442695, %v442_v49 }
 0x321   : > { %1026 = vpow2.f32 %v443_v50 }
 0x323   : > { %v1025_v51 = vpop.eup %1024 }
 0x324   : > { %v560_v52 = vpop.xlane.xlu0 %559  ;;  %v330_v53 = vsel %vm277_vm2, %v1025_v51, 0.0 }
 0x325   : > { %v561_v54 = vsub.f32 %v552_v35, %v560_v52  ;;  %331 = vadd.xlane.f32.xlu0 %v330_v53 }
 0x327   : > { %v562_v55 = vmul.f32 1.442695, %v561_v54 }
 0x329   : > { %1028 = vpow2.f32 %v562_v55 }
 0x32b   : > { %v1027_v56 = vpop.eup %1026 }
 0x32c   : > { %v445_v57 = vsel %vm277_vm2, %v1027_v56, 0.0  ;;  %v679_v60 = vpop.xlane.xlu1 %678 }
 0x32d   : > { %446 = vadd.xlane.f32.xlu1 %v445_v57  ;;  %v680_v61 = vsub.f32 %v671_v40, %v679_v60 }
 0x32f   : > { %v681_v62 = vmul.f32 1.442695, %v680_v61 }
 0x331   : > { %1030 = vpow2.f32 %v681_v62 }
 0x333   : > { %v1029_v58 = vpop.eup %1028 }
 0x334   : > { %v564_v59 = vsel %vm277_vm2, %v1029_v58, 0.0 }
 0x335   : > { %565 = vadd.xlane.f32.xlu0 %v564_v59 }
 0x33b   : > { %v1031_v63 = vpop.eup %1030 }
 0x33c   : > { %v683_v1 = vsel %vm277_vm2, %v1031_v63, 0.0 }
 0x33e   : > { %451 = vrot.lane.b32.xlu1 %v1372_v11, %s1183_s11  ;;  %s1104_s11 = scalar_lea.vmem %s1103_s10, 128 }
 0x33f   : > { %p1106_p13 = scmp.lt.s32.totalorder %s1104_s11, %s1098_s9 }
 0x341   : > { %p1107_p3 = por %p1106_p13, %p1105_p10 }
 0x343   : > { %p1108_p7 = pnand %p1107_p3, %p1101_p8 }
 0x34b   : > { %336 = vrot.lane.b32.xlu0 %v1372_v11, %s1184_s27 }
 0x34f   : > { %689 = vrot.lane.b32.xlu0 %v1372_v11, %s1185_s28 }
 0x362   : > { %684 = vadd.xlane.f32.xlu1 %v683_v1 }
 0x373   : > { %570 = vrot.lane.b32.xlu1 %v1372_v11, %s1186_s29 }
 0x3b2   : > { %v332_v2 = vpop.xlane.xlu0 %331 }
 0x3b3   : > { %1032 = vrcp.f32 %v332_v2 }
 0x3ba   : > { %v447_v3 = vpop.xlane.xlu1 %446 }
 0x3bb   : > { %1034 = vrcp.f32 %v447_v3 }
 0x3bd   : > { %v1033_v4 = vpop.eup %1032 }
 0x3be   : > { %v334_v6 = vmul.f32 %v1033_v4, %v1025_v51  ;;  %v452_v9 = vpop.permute.xlu1 %451 }
 0x3bf   : > { %v457_v13 = vsel %vm341_vm3, %v452_v9, 0 }
 0x3c0   : > { %v335_v10 = vpack.c.bf16 %v334_v6, %v334_v6 }
 0x3c2   : > { %v566_v5 = vpop.xlane.xlu0 %565 }
 0x3c3   : > { %1036 = vrcp.f32 %v566_v5 }
 0x3c5   : > { %v1035_v12 = vpop.eup %1034 }
 0x3c6   : > { %v337_v7 = vpop.permute.xlu0 %336  ;;  %v449_v11 = vmul.f32 %v1035_v12, %v1027_v56 }
 0x3c7   : > { %v343_v8 = vsel %vm341_vm3, %v337_v7, 0 }
 0x3c8   : > { %906 = vmatpush3.bf16.msra.mxu0 %v343_v8  ;;  %v450_v14 = vpack.c.bf16 %v449_v11, %v449_v11 }
 0x3c9   : > { %917 = vmatprep.subr.bf16.mxu0 %v1174_v0 }
 0x3ca   : > { %v690_v20 = vpop.permute.xlu0 %689 }
 0x3cb   : > { %908 = vmatmul.mubr.msk.bf16.vlgmr.msra.gmra.mrb[4].mxu0 %vm277_vm2, %v335_v10  ;;  %v695_v22 = vsel %vm341_vm3, %v690_v20, 0 }
 0x3cc   : > { %918 = vmatpush3.bf16.msra.mxu0 %v457_v13  ;;  %919 = vmatprep.mubr.msk.bf16.mxu0 %vm1175_vm0, %v1174_v0 }
 0x3cd   : > { %929 = vmatprep.subr.bf16.mxu0 %v1174_v0  ;;  %v1037_v15 = vpop.eup %1036 }
 0x3ce   : > { %v568_v17 = vmul.f32 %v1037_v15, %v1029_v58 }
 0x3d0   : > { %v569_v21 = vpack.c.bf16 %v568_v17, %v568_v17 }
 0x3d3   : > { %920 = vmatmul.mubr.msk.bf16.vlgmr.msra.gmra.mrb[8].mxu0 %vm277_vm2, %v450_v14 }
 0x3d4   : > { %931 = vmatprep.mubr.msk.bf16.mxu0 %vm1175_vm0, %v1174_v0 }
 0x3ef   : > { %v685_v16 = vpop.xlane.xlu1 %684 }
 0x3f0   : > { %1038 = vrcp.f32 %v685_v16 }
 0x3f3   : > { %v571_v18 = vpop.permute.xlu1 %570 }
 0x3f4   : > { %v576_v19 = vsel %vm341_vm3, %v571_v18, 0 }
 0x3f5   : > { %930 = vmatpush3.bf16.msra.mxu0 %v576_v19 }
 0x3f6   : > { %941 = vmatprep.subr.bf16.mxu0 %v1174_v0 }
 0x3f8   : > { %932 = vmatmul.mubr.msk.bf16.vlgmr.msra.gmra.mrb[12].mxu0 %vm277_vm2, %v569_v21 }
 0x3f9   : > { %942 = vmatpush3.bf16.msra.mxu0 %v695_v22  ;;  %943 = vmatprep.mubr.msk.bf16.mxu0 %vm1175_vm0, %v1174_v0 }
 0x3fa   : > { %v1039_v23 = vpop.eup %1038 }
 0x3fb   : > { %v687_v24 = vmul.f32 %v1039_v23, %v1031_v63 }
 0x3fd   : > { %v688_v25 = vpack.c.bf16 %v687_v24, %v687_v24 }
 0x400   : > { %944 = vmatmul.mubr.msk.bf16.vlgmr.msra.gmra.mrb[16].mxu0 %vm277_vm2, %v688_v25 }
 0x49e   : > { %v379_v26 = vpop.f32.mrb[4].mxu0 }
 0x49f   : > { %v385_v27 = vpack.c.bf16 %v379_v26, %v379_v26  ;;  %v909_v28 = vpop.f32.mrb[5].mxu0 }
 0x4a0   : > { %v382_v29 = vpop.f32.mrb[6].mxu0 }
 0x4a1   : > { %387 = vst.msk [vmem:[%s1425_s22] sm:$0xf] %vm386_vm4, %v385_v27  ;;  %v910_v30 = vpop.f32.mrb[7].mxu0 }
 0x4a6   : > { %v493_v31 = vpop.f32.mrb[8].mxu0 }
 0x4a7   : > { %v869_v32 = vpack.c.bf16 %v493_v31, %v493_v31  ;;  %v921_v33 = vpop.f32.mrb[9].mxu0 }
 0x4a8   : > { %v496_v0 = vpop.f32.mrb[10].mxu0 }
 0x4a9   : > { %503 = vrot.lane.b32.xlu1 %v869_v32, %s1187_s6  ;;  %v922_v34 = vpop.f32.mrb[11].mxu0 }
 0x4cb   : > { %v612_v35 = vpop.f32.mrb[12].mxu0 }
 0x4cc   : > { %v870_v36 = vpack.c.bf16 %v612_v35, %v612_v35  ;;  %v933_v37 = vpop.f32.mrb[13].mxu0 }
 0x4cd   : > { %v615_v38 = vpop.f32.mrb[14].mxu0 }
 0x4ce   : > { %622 = vrot.lane.b32.xlu0 %v870_v36, %s1188_s7  ;;  %v934_v39 = vpop.f32.mrb[15].mxu0 }
 0x4d3   : > { %v731_v40 = vpop.f32.mrb[16].mxu0 }
 0x4d4   : > { %v871_v41 = vpack.c.bf16 %v731_v40, %v731_v40  ;;  %v945_v42 = vpop.f32.mrb[17].mxu0 }
 0x4d5   : > { %v734_v43 = vpop.f32.mrb[18].mxu0 }
 0x4d6   : > { %741 = vrot.lane.b32.xlu1 %v871_v41, %s1189_s18  ;;  %v946_v44 = vpop.f32.mrb[19].mxu0 }
 0x51b   : > { %v504_v45 = vpop.permute.xlu1 %503 }
 0x51c   : > { %507 = vst.msk [vmem:[%s1425_s22] sm:$0xf] %vm506_vm5, %v504_v45 }
 0x540   : > { %v623_v46 = vpop.permute.xlu0 %622 }
 0x541   : > { %626 = vst.msk [vmem:[%s1425_s22] sm:$0xf] %vm625_vm6, %v623_v46 }
 0x548   : > { %v742_v47 = vpop.permute.xlu1 %741 }
 0x549   : > { %745 = vst.msk [vmem:[%s1425_s22] sm:$0xf] %vm744_vm7, %v742_v47 }
 0x54a   : > { %1111 = shalt.err (!%p1108_p7)
}
 0x54b   : > { %s1112_s30 = scalar_lea.hbm %s1435_s5, 64  ;;  %s1116_s29 = scalar_lea.hbm %s1483_s3, 128 }
 0x54c   : > { %p1113_p9 = scmp.ne.s32.totalorder %s1435_s5, %s1112_s30  ;;  %p1117_p0 = scmp.lt.u32.totalorder %s1435_s5, %s1483_s3 }
 0x54d   : > { %p1118_p1 = scmp.lt.u32.totalorder %s1116_s29, %s1112_s30  ;;  %p1120_p4 = scmp.lt.u32.totalorder %s1112_s30, %s1435_s5 }
 0x54e   : > { %p1114_p2 = pnand %p1113_p9, %p1302_p12 }
 0x54f   : > { %p1119_p11 = por %p1118_p1, %p1117_p0 }
 0x550   : > { %p1115_p5 = pneg %p1114_p2 }
 0x551   : > { %p1121_p6 = por %p1120_p4, %p1119_p11 }
 0x553   : > { %p1122_p8 = pnand %p1121_p6, %p1115_p5 }
 0x555   : > { %1125 = shalt.err (!%p1122_p8)
}
 0x556   : > { %953 = dma.vmem_to_hbm [thread:$0]  (%p1302_p12), %s1437_s4, 64, %s1435_s5, %s747_s8  }
 0x557 PF: > { %s772_s6 = sand.u32 1, %s1156_s12   ;;  %p1498_p10 = scmp.ne.s32.totalorder %s1488_s19, 0 }
 0x558   : > { %p1499_p13 = scmp.ge.s32.totalorder %s1168_s15, 2  ;;  %s773_s7 = scalar_lea.sflag [#allocation4], %s772_s6 }
 0x55a   : > { %p964_p3 = pnand %p1499_p13, %p1498_p10 }
 0x55c   : > { %1151 = dma.done.wait (!%p964_p3), %s773_s7, 64  }
 0x55d   : > { %1153 = vsyncadd (!%p964_p3), %s773_s7, 4294967232  ;;  %p17_p7 = scmp.ge.s32.totalorder %s1267_s24, 4   ;;  %s1500_s12 = smov %s1160_s13 }
 0x55e   : > { %s1501_s13 = smov %s1164_s14  ;;  %s1502_s14 = smov %s1298_s17 }
 0x55f   : > { %s1503_s15 = smov %s1267_s24  ;;  %19 = sbr.rel (!%p17_p7) target bundleno = 6 (0x6), region = 81 }
 0x566   :  { %778 = vsyncpa [#allocation3], 1 }
 0x567   :  { %780 = vsyncpa [#allocation3 + $0x1], 1 }
 0x568   :  { %781 = vsyncpa [#allocation6], 1 }
 0x569   :  { %782 = vsyncpa [#allocation4], 1 }
 0x56a   :  { %784 = vsyncpa [#allocation4 + $0x1], 1 }

</bundles_post_ra>
